<compile_context>
chip_gen: v6e
topology: v6e:2x2x1
jax: 0.10.0
libtpu: 0.0.40
codegen_flags: <defaults>
</compile_context>

<pallas_src>
import jax
import jax.numpy as jnp
from jax import lax
from jax.experimental import pallas as pl
from jax.experimental.pallas import tpu as pltpu


def _direction_kernel(x_ref, qt_ref, o_ref):
    # x_ref : (B, K)  caller dtype (f32 or bf16), K = motion_dim (lanes)
    # qt_ref: (Kp, N) bf16, K <= Kp, rows K..Kp-1 are zero (sublanes)
    # o_ref : (B, N)  caller dtype
    k = x_ref.shape[1]
    kp = qt_ref.shape[0]

    # Cheap VPU convert on (B, K) elements; feeds the MXU its native bf16.
    xb = x_ref[...].astype(jnp.bfloat16)
    if kp != k:
        # Zero-extend the contraction (lane) dim so the MXU sees the full,
        # tile-aligned (Kp, N) cached Qt.  Padded Qt rows are zero, so the
        # extra products contribute exactly 0.
        xb = jnp.pad(xb, ((0, 0), (0, kp - k)))

    # Canonical [B,K]@[K,N] MXU feed, lane-dense N=512 output, f32 accumulate.
    o_ref[...] = lax.dot_general(
        xb,
        qt_ref[...],
        dimension_numbers=(((1,), (0,)), ((), ())),
        preferred_element_type=jnp.float32,
    ).astype(o_ref.dtype)


def direction_prepare(weight, compute_dtype=jnp.bfloat16):
    """One-time parameter setup: QR of (weight + 1e-8).

    Returns (Q, Qt):
      Q : (512, motion_dim) float32  -- the input=None path (torch returns f32 here too).
      Qt: (Kp, 512) compute_dtype    -- cached, pre-transposed, zero-padded MXU operand
                                        (Kp = motion_dim rounded up to a multiple of 16).
    Call once per weight update, NOT on every forward.
    """
    # TODO(synk): QR (iterative Householder factorization) has no clean Pallas
    # equivalent; it is pure parameter setup, computed here with jnp.linalg.qr
    # and hoisted out of the per-call forward path.
    w = (weight + 1e-8).astype(jnp.float32)
    Q, _R = jnp.linalg.qr(w)  # reduced QR, Q: (512, motion_dim)
    # NOTE: QR column signs are ambiguous between LAPACK backends; if exact
    # numerical parity with a trained PyTorch checkpoint matters, enforce a
    # sign convention (e.g. flip columns so diag(R) > 0) here.
    m = Q.shape[1]
    kp = ((m + 15) // 16) * 16  # bf16 sublane tile is 16 rows -> exactly tiled layout
    Qt = jnp.pad(Q.T, ((0, kp - m), (0, 0))).astype(compute_dtype)  # (Kp, 512)
    return Q, Qt


@jax.jit
def direction_apply(x, Qt):
    """Hot path: out = x @ Q.T, a single grid-less Pallas call (no wrapper HLOs)."""
    B = x.shape[0]
    N = Qt.shape[1]
    return pl.pallas_call(
        _direction_kernel,
        out_shape=jax.ShapeDtypeStruct((B, N), x.dtype),
        # No grid: one tile of work; full arrays resident in VMEM (~25 KiB).
        in_specs=[
            pl.BlockSpec(memory_space=pltpu.MemorySpace.VMEM),
            pl.BlockSpec(memory_space=pltpu.MemorySpace.VMEM),
        ],
        out_specs=pl.BlockSpec(memory_space=pltpu.MemorySpace.VMEM),
    )(x, Qt)


def direction_forward(x, weight):
    """Full equivalent of Direction.forward.

    Recomputes QR; prefer direction_prepare(...) once + direction_apply(...)
    per call so the factorization (and the bf16 Qt cache) is reused.
    """
    Q, Qt = direction_prepare(weight)
    if x is None:
        return Q  # float32, matching torch.qr(weight.float())
    return direction_apply(x, Qt)


if __name__ == "__main__":
    key = jax.random.PRNGKey(0)
    k_w, k_x = jax.random.split(key)

    motion_dim = 20  # LIA uses motion_dim=20
    batch = 2

    # Deterministic "parameter" init matching nn.Parameter(torch.randn(512, motion_dim))
    weight = jax.random.normal(k_w, (512, motion_dim), dtype=jnp.float32)
    x = jax.random.normal(k_x, (batch, motion_dim), dtype=jnp.float32)

    # One-time setup (cached Q / bf16 Qt), then the Pallas hot path.
    Q, Qt = direction_prepare(weight)
    out = jax.block_until_ready(direction_apply(x, Qt))
    assert out.shape == (batch, 512), out.shape
    assert out.dtype == x.dtype, out.dtype

    # Bit-for-bit-style check against the same bf16-operand / f32-accumulate math.
    x_bf = x.astype(jnp.bfloat16).astype(jnp.float32)
    qt_bf = Q.T.astype(jnp.bfloat16).astype(jnp.float32)
    ref_bf16 = jnp.dot(x_bf, qt_bf, preferred_element_type=jnp.float32)
    assert jnp.allclose(out, ref_bf16, atol=1e-4, rtol=1e-4)

    # Semantic check against the true f32 reference (diag_embed->matmul->sum == x @ Q.T);
    # loose tolerance accounts for the deliberate bf16 MXU feed.
    ref_f32 = jnp.einsum("bi,ji->bj", x, Q)
    assert jnp.allclose(out, ref_f32, atol=5e-2, rtol=5e-2)

    # input=None path returns Q directly (float32, as in torch.qr(weight.float()))
    q_only = jax.block_until_ready(direction_forward(None, weight))
    assert q_only.shape == (512, motion_dim)

    print("KERNEL_OK")
</pallas_src>

<mosaic_0001>
module attributes {stable_mosaic.version = 11 : i64} {
  func.func @_direction_kernel(%arg0: memref<2x20xf32, #tpu.memory_space<vmem>>, %arg1: memref<32x512xbf16, #tpu.memory_space<vmem>>, %arg2: memref<2x512xf32, #tpu.memory_space<vmem>>) attributes {dimension_semantics = [], scalar_prefetch = 0 : i64, scratch_operands = 0 : i64, tpu.core_type = #tpu.core_type<tc>} {
    %c0 = arith.constant 0 : index
    %c0_0 = arith.constant 0 : index
    %0 = vector.load %arg0[%c0, %c0_0] : memref<2x20xf32, #tpu.memory_space<vmem>>, vector<2x20xf32>
    %1 = arith.truncf %0 : vector<2x20xf32> to vector<2x20xbf16>
    %c0_i32 = arith.constant 0 : i32
    %2 = arith.sitofp %c0_i32 : i32 to bf16
    %3 = vector.broadcast %2 : bf16 to vector<2x12xbf16>
    %4 = tpu.concatenate %1, %3 in 1 : vector<2x20xbf16>, vector<2x12xbf16> -> vector<2x32xbf16>
    %c0_1 = arith.constant 0 : index
    %c0_2 = arith.constant 0 : index
    %5 = vector.load %arg1[%c0_1, %c0_2] : memref<32x512xbf16, #tpu.memory_space<vmem>>, vector<32x512xbf16>
    %cst = arith.constant dense<0.000000e+00> : vector<2x512xf32>
    %6 = tpu.matmul %4, %5, %cst {dimension_numbers = #tpu.dot_dimension_numbers<[1], [0], [0], [1], [0, 0, 1, 1], [], []>} : vector<2x32xbf16>, vector<32x512xbf16>, vector<2x512xf32> -> vector<2x512xf32>
    %c0_3 = arith.constant 0 : index
    %c0_4 = arith.constant 0 : index
    %7 = vector.load %arg2[%c0_3, %c0_4] : memref<2x512xf32, #tpu.memory_space<vmem>>, vector<2x512xf32>
    tpu.vector_store %arg2[%c0_3, %c0_4], %6 {strides = array<i32>} : memref<2x512xf32, #tpu.memory_space<vmem>>, vector<2x512xf32>,
    return
  }
}

</mosaic_0001>

<bundles_post_ra>
// kernel: direction_apply.1
= control target key start
LH: loop header
LB: loop body
LE: loop exit
PB: predicated region body
PF: predicated region fallthrough
CT: control target
= control target key end

     0   :  { %7 = vsyncpa [#allocation3], 0  ;;  %s343_s0 = inlined_call_operand.hbm [shape: f32[2,20], index: 0, kind: input, shape index: {}]   ;;  %s344_s1 = inlined_call_operand.hbm [shape: bf16[32,512], index: 1, kind: input, shape index: {}]   ;;  %s345_s2 = inlined_call_operand.hbm [shape: f32[2,512], index: 2, kind: output, shape index: {}]  }
   0x1   :  { %8 = vsyncpa [#allocation6], 0 }
   0x2   :  { %9 = vsyncpa [#allocation4], 0  ;;  %s312_s9 = smov [#allocation2]   ;;  %s313_s11 = smov [#allocation5]  }
   0x3   :  { %s16_s10 = sshll.u32 %s312_s9, 4  ;;  %s25_s12 = sshll.u32 %s313_s11, 4  ;;  %s17_s10 = int_to_ptr.vmem [resolvable:$true] %s16_s10  ;;  %s26_s12 = int_to_ptr.vmem [resolvable:$true] %s25_s12 }
   0x4   :  { %s254_s13 = scalar_lea.vmem %s17_s10, 32  ;;  %p259_p1 = scmp.lt.s32.totalorder %s17_s10, %s17_s10 }
   0x5   :  { %p255_p0 = scmp.ne.s32.totalorder %s17_s10, %s254_s13  ;;  %p260_p2 = scmp.lt.s32.totalorder %s254_s13, %s254_s13 }
   0x7   :  { %p261_p3 = por %p260_p2, %p259_p1 }
   0x9   :  { %p262_p4 = pnand %p261_p3, %p255_p0 }
   0xb   :  { %265 = shalt.err (!%p262_p4)
}
   0xc   :  { %19 = dma.hbm_to_vmem [thread:$0]  %s343_s0, 32, %s17_s10, [#allocation3]  }
   0xd   :  { %s274_s16 = scalar_lea.vmem %s26_s12, 1024  ;;  %p279_p6 = scmp.lt.s32.totalorder %s26_s12, %s26_s12 }
   0xe   :  { %p275_p5 = scmp.ne.s32.totalorder %s26_s12, %s274_s16  ;;  %p280_p7 = scmp.lt.s32.totalorder %s274_s16, %s274_s16 }
  0x10   :  { %p281_p8 = por %p280_p7, %p279_p6 }
  0x12   :  { %p282_p9 = pnand %p281_p8, %p275_p5 }
  0x14   :  { %285 = shalt.err (!%p282_p9)
}
  0x15   :  { %s314_s17 = smov 256   ;;  %s315_s18 = smov 16  }
  0x16   :  { %31 = dma.hbm_to_vmem [thread:$0]  %s344_s1, 1024, %s26_s12, [#allocation6], %s314_s17, %s314_s17, %s315_s18  }
  0x17   :  { %306 = dma.done.wait [#allocation3], 32  }
  0x18   :  { %307 = vsyncadd [#allocation3], 4294967264 }
  0x19   :  { %308 = dma.done.wait [#allocation6], 1024  }
  0x1a   :  { %309 = vsyncadd [#allocation6], 4294966272  ;;  %v316_v0 = vmov 0   ;;  %v234_v1 = vld [vmem:[#allocation5 + $0x24] ss:$16 sps:$4 sm:$0xff]   ;;  %vm41_vm0 = vcmask 162816   ;;  %v187_v14 = vlaneseq }
  0x1b   :  { %128 = vmatprep.mubr.bf16.mxu0 %v316_v0  ;;  %169 = vmatprep.mubr.bf16.mxu1 %v316_v0  ;;  %v236_v2 = vld [vmem:[#allocation5 + $0x2c] ss:$16 sps:$4 sm:$0xff]   ;;  %v238_v3 = vld [vmem:[#allocation5 + $0x20] ss:$16 sps:$4 sm:$0xff]   ;;  %v239_v4 = vld [vmem:[#allocation5 + $0x28] ss:$16 sps:$4 sm:$0xff]  }
  0x1c   :  { %108 = vmatprep.subr.bf16.mxu0 %v234_v1  ;;  %149 = vmatprep.subr.bf16.mxu1 %v236_v2  ;;  %v240_v5 = vld [vmem:[#allocation5 + $0x4] ss:$16 sps:$4 sm:$0xff]   ;;  %v242_v6 = vld [vmem:[#allocation5 + $0xc] ss:$16 sps:$4 sm:$0xff]   ;;  %v244_v7 = vld [vmem:[#allocation5] ss:$16 sps:$4 sm:$0xff]  }
  0x1d   :  { %109 = vmatpush1.bf16.msra.mxu0 %v238_v3  ;;  %150 = vmatpush1.bf16.msra.mxu1 %v239_v4  ;;  %v245_v8 = vld [vmem:[#allocation5 + $0x8] ss:$16 sps:$4 sm:$0xff]   ;;  %v39_v9 = vld [vmem:[#allocation2] sm:$0x3]  ;;  %vm93_vm1 = vcmask 261120   ;;  %v188_v16 = vshrl.u32 %v187_v14, 7 }
  0x1e   :  { %110 = vmatprep.subr.bf16.mxu0 %v240_v5  ;;  %151 = vmatprep.subr.bf16.mxu1 %v242_v6  ;;  %v40_v10 = vpack.c.bf16 %v39_v9, %v39_v9  ;;  %v317_v12 = vmov 1983009808   ;;  %s318_s0 = smov [#allocation7]  }
  0x1f   :  { %v185_v13 = vunpack.c.l.s4 %v317_v12  ;;  %s207_s1 = sshll.u32 %s318_s0, 4  ;;  %s208_s1 = int_to_ptr.vmem [resolvable:$true] %s207_s1 }
  0x20   :  { %v44_v11 = vsel %vm41_vm0, %v40_v10, 0  ;;  %s286_s21 = scalar_lea.vmem %s208_s1, 128  ;;  %p291_p11 = scmp.lt.s32.totalorder %s208_s1, %s208_s1 }
  0x21   :  { %111 = vmatpush1.bf16.msra.mxu0 %v244_v7  ;;  %152 = vmatpush1.bf16.msra.mxu1 %v245_v8  ;;  %v186_v15 = vunpack.c.0.s8 %v185_v13  ;;  %p287_p10 = scmp.ne.s32.totalorder %s208_s1, %s286_s21  ;;  %p292_p12 = scmp.lt.s32.totalorder %s286_s21, %s286_s21 }
  0x23   :  { %v189_v19 = vsub.s32 %v186_v15, %v188_v16  ;;  %p293_p13 = por %p292_p12, %p291_p11 }
  0x24   :  { %225 = vmatmul.mubr.msk.bf16.vlgmr.msra.gmra.mxu0 %vm93_vm1, %v44_v11  ;;  %226 = vmatmul.mubr.msk.bf16.vlgmr.msra.gmra.mxu1 %vm93_vm1, %v44_v11 }
  0x25   :  { %p294_p0 = pnand %p293_p13, %p287_p10 }
  0xe4   :  { %v130_v17 = vpop.f32.mrf.mxu0  ;;  %v171_v18 = vpop.f32.mrf.mxu1 }
  0xe6   :  { %v132_v20 = vpop.f32.mrf.mxu0  ;;  %v173_v21 = vpop.f32.mrf.mxu1 }
  0xe7   :  { %v182_v22 = vcombine.low %v130_v17, %v132_v20  ;;  %v183_v23 = vcombine.low %v171_v18, %v173_v21 }
  0xe8   :  { %v134_v24 = vpop.f32.mrf.mxu0  ;;  %v175_v25 = vpop.f32.mrf.mxu1 }
  0xe9   :  { %v190_v26 = vrot.slane %v182_v22, %v189_v19  ;;  %v197_v27 = vrot.slane %v183_v23, %v189_v19 }
  0xea   :  { %v135_v28 = vpop.f32.mrf.mxu0  ;;  %v176_v29 = vpop.f32.mrf.mxu1 }
  0xeb   :  { %v198_v30 = vcombine.low %v190_v26, %v197_v27 }
  0xed   :  { %200 = vst [vmem:[#allocation7] sm:$0xff] %v198_v30 }
  0xee   :  { %297 = shalt.err (!%p294_p0)
}
  0xef   :  { %210 = dma.vmem_to_hbm [thread:$0]  %s208_s1, 128, %s345_s2, [#allocation4]  }
  0xf0   :  { %310 = dma.done.wait [#allocation4], 128  }
  0xf1   :  { %311 = vsyncadd [#allocation4], 4294967168 }
  0xf2   :  { %214 = vsyncpa [#allocation3], 1 }
  0xf3   :  { %215 = vsyncpa [#allocation6], 1 }
  0xf4   :  { %216 = vsyncpa [#allocation4], 1 }

</bundles_post_ra>
